<compile_context>
chip_gen: v5e
topology: v5e:2x2
jax: 0.10.0
libtpu: 0.0.40
codegen_flags: <defaults>
</compile_context>

<pallas_src>
from functools import partial

import jax
import jax.numpy as jnp
from jax.experimental import pallas as pl
from jax.experimental.pallas import tpu as pltpu

BN_EPS = 1e-5


def _round_up(x, m):
    return ((x + m - 1) // m) * m


def spatial_kernel(so_ref, predi_ref, wbr_ref, w4r_ref, vec_ref, out_ref, *, b_real):
    # so_ref    : (8, Bp)  f32   rows 0:4 subj.T, rows 4:8 obj.T, padded lanes zero
    # predi_ref : (1, Bp)  int32 predicate ids, padded lanes are -1
    # wbr_ref   : (3F, 8+Pp) f32 block-diag [W1 | W2 | W3] (PyTorch (out,in) layout)
    # w4r_ref   : (H, 3F)  f32   [W4 W4 W4]
    # vec_ref   : (3F, 8)  f32   col0 gamma123, col1 beta123, col2[:H] gamma4,
    #                            col3[:H] beta4, col4[:H] w5, [0,5] b5
    # out_ref   : (1, Bp)  f32   lane-dense logits (padded lanes are garbage)
    kin = wbr_ref.shape[1]
    h = w4r_ref.shape[0]
    bp = out_ref.shape[1]
    pp = kin - 8                      # padded predicate width (multiple of 8)
    inv_b = 1.0 / float(b_real)

    vc = vec_ref[...]

    # --- predicate one-hot built in VMEM (never touches HBM) -----------------
    pred = predi_ref[...]                                        # (1, Bp)
    iota = jax.lax.broadcasted_iota(jnp.int32, (pp, bp), 0)
    one_hot = (iota == pred).astype(jnp.float32)                 # (Pp, Bp)

    # --- X = [subj.T ; obj.T ; one_hot]  (8+Pp, Bp), aligned sublane concat ---
    x = jnp.concatenate([so_ref[...], one_hot], axis=0)

    # --- fused block-diagonal branch matmul (subj | obj | predicate) ---------
    a = jnp.dot(wbr_ref[...], x, preferred_element_type=jnp.float32)   # (3F, Bp)

    # --- BN1/2/3 (training mode): one-pass stats, folded scale/shift, ReLU ---
    # Padded batch columns of `a` are exactly zero (zero X columns, biases
    # dropped), so the lane sums divided by the real B give exact statistics.
    g123 = vc[:, 0:1]
    be123 = vc[:, 1:2]
    s1 = jnp.sum(a, axis=1, keepdims=True)
    s2 = jnp.sum(a * a, axis=1, keepdims=True)
    mu = s1 * inv_b
    var = jnp.maximum(s2 * inv_b - mu * mu, 0.0)
    scale = jax.lax.rsqrt(var + BN_EPS) * g123
    shift = be123 - mu * scale
    a = jnp.maximum(a * scale + shift, 0.0)

    # --- linear4 with tripled W4: 3-branch sum folded into the MXU -----------
    z = jnp.dot(w4r_ref[...], a, preferred_element_type=jnp.float32)   # (H, Bp)
    if b_real != bp:
        # Re-zero padded lanes (post-ReLU shift made them nonzero) so the BN4
        # batch statistics stay exact.
        lane = jax.lax.broadcasted_iota(jnp.int32, (1, bp), 1)
        z = jnp.where(lane < b_real, z, 0.0)

    # --- BN4 + ReLU (same one-pass / folded form) -----------------------------
    g4 = vc[0:h, 2:3]
    be4 = vc[0:h, 3:4]
    t1 = jnp.sum(z, axis=1, keepdims=True)
    t2 = jnp.sum(z * z, axis=1, keepdims=True)
    mu4 = t1 * inv_b
    var4 = jnp.maximum(t2 * inv_b - mu4 * mu4, 0.0)
    scale4 = jax.lax.rsqrt(var4 + BN_EPS) * g4
    shift4 = be4 - mu4 * scale4
    z = jnp.maximum(z * scale4 + shift4, 0.0)

    # --- linear5 head: VPU multiply + sublane reduce (no 1-wide MXU pass) -----
    w5 = vc[0:h, 4:5]
    b5 = vc[0:1, 5:6]
    out_ref[...] = jnp.sum(z * w5, axis=0, keepdims=True) + b5          # (1, Bp)


def init_params(key, feature_dim, predicate_dim):
    """Deterministic parameter init (PyTorch nn.Linear-style uniform bounds)."""
    half = feature_dim // 2
    keys = jax.random.split(key, 10)

    def linear(kw, kb, fan_in, fan_out):
        bound = 1.0 / jnp.sqrt(fan_in)
        w = jax.random.uniform(kw, (fan_out, fan_in), jnp.float32, -bound, bound)
        b = jax.random.uniform(kb, (fan_out,), jnp.float32, -bound, bound)
        return w, b

    w1, b1 = linear(keys[0], keys[1], 4, feature_dim)
    w2, b2 = linear(keys[2], keys[3], 4, feature_dim)
    w3, b3 = linear(keys[4], keys[5], predicate_dim, feature_dim)
    w4, b4 = linear(keys[6], keys[7], feature_dim, half)
    w5, b5 = linear(keys[8], keys[9], half, 1)

    bn = lambda n: (jnp.ones((n,), jnp.float32), jnp.zeros((n,), jnp.float32))
    g1, be1 = bn(feature_dim)
    g2, be2 = bn(feature_dim)
    g3, be3 = bn(feature_dim)
    g4, be4 = bn(half)

    return dict(w1=w1, b1=b1, g1=g1, be1=be1,
                w2=w2, b2=b2, g2=g2, be2=be2,
                w3=w3, b3=b3, g3=g3, be3=be3,
                w4=w4, b4=b4, g4=g4, be4=be4,
                w5=w5, b5=b5)


def pack_params(params):
    """One-time packing of the parameter tensors into 3 exact-size f32 buffers.

    b1..b4 are intentionally NOT packed: a constant per-feature bias before a
    training-mode BatchNorm is numerically dead (cancelled by the batch-mean
    subtraction; variance unchanged).  Only b5 survives.
    """
    f = params["w1"].shape[0]
    p = params["w3"].shape[1]
    h = params["w4"].shape[0]
    pp = _round_up(p, 8)

    # Block-diagonal branch weight: cols 0:4 subj, 4:8 obj, 8:8+P predicate.
    wbr = jnp.zeros((3 * f, 8 + pp), jnp.float32)
    wbr = wbr.at[0:f, 0:4].set(params["w1"])
    wbr = wbr.at[f:2 * f, 4:8].set(params["w2"])
    wbr = wbr.at[2 * f:3 * f, 8:8 + p].set(params["w3"])

    # Tripled fuse weight: z = [W4 W4 W4] @ [s1; s2; s3] == W4 @ (s1+s2+s3).
    w4r = jnp.concatenate([params["w4"], params["w4"], params["w4"]], axis=1)

    vec = jnp.zeros((3 * f, 8), jnp.float32)
    vec = vec.at[:, 0].set(jnp.concatenate([params["g1"], params["g2"], params["g3"]]))
    vec = vec.at[:, 1].set(jnp.concatenate([params["be1"], params["be2"], params["be3"]]))
    vec = vec.at[0:h, 2].set(params["g4"])
    vec = vec.at[0:h, 3].set(params["be4"])
    vec = vec.at[0:h, 4].set(params["w5"].reshape(-1))
    vec = vec.at[0, 5].set(params["b5"][0])

    return {"wbr": wbr, "w4r": w4r, "vec": vec}


@jax.jit
def simple_spatial_forward(subj, obj, predi, wbr, w4r, vec):
    """Whole forward under one jit: glue fuses into a single dispatch + kernel."""
    b = subj.shape[0]
    bp = _round_up(max(b, 1), 128)          # lane-dense batch

    # Fused pad + transpose + stack of the two 4-wide inputs into one (8, Bp)
    # slab (this buffer must be written anyway for the batch padding, so the
    # kernel input stays a single tiny DMA and no (8+P, B) X buffer ever hits HBM).
    so_t = jnp.zeros((8, bp), jnp.float32)
    so_t = so_t.at[0:4, :b].set(jnp.asarray(subj, jnp.float32).T)
    so_t = so_t.at[4:8, :b].set(jnp.asarray(obj, jnp.float32).T)

    predi_p = jnp.full((1, bp), -1, jnp.int32)
    predi_p = predi_p.at[0, :b].set(jnp.asarray(predi, jnp.int32))

    vmem = pl.BlockSpec(memory_space=pltpu.MemorySpace.VMEM)
    out = pl.pallas_call(
        partial(spatial_kernel, b_real=b),
        out_shape=jax.ShapeDtypeStruct((1, bp), jnp.float32),
        in_specs=[vmem, vmem, vmem, vmem, vmem],
        out_specs=vmem,
    )(so_t, predi_p, wbr, w4r, vec)

    # TODO(synk): for very large B add a B-tiled grid with accumulated BN stats
    # (and a 2-way parallel split on v7x) instead of this single-shot body.
    return out[0, :b].squeeze()             # matches PyTorch .squeeze()


def reference_forward(subj, obj, predi, params):
    """Pure-JAX reproduction of the original PyTorch forward (with biases)."""
    def bn_relu(v, g, be):
        mu = jnp.mean(v, axis=0, keepdims=True)
        var = jnp.mean((v - mu) ** 2, axis=0, keepdims=True)
        return jnp.maximum((v - mu) * jax.lax.rsqrt(var + BN_EPS) * g + be, 0.0)

    q = params
    s = bn_relu(subj @ q["w1"].T + q["b1"], q["g1"], q["be1"])
    o = bn_relu(obj @ q["w2"].T + q["b2"], q["g2"], q["be2"])
    oh = jax.nn.one_hot(predi, q["w3"].shape[1], dtype=jnp.float32)
    pr = bn_relu(oh @ q["w3"].T + q["b3"], q["g3"], q["be3"])
    fused = bn_relu((s + o + pr) @ q["w4"].T + q["b4"], q["g4"], q["be4"])
    return (fused @ q["w5"].T + q["b5"]).squeeze()


if __name__ == "__main__":
    feature_dim = 32
    predicate_dim = 8
    batch = 8

    key = jax.random.PRNGKey(0)
    k_param, k_subj, k_obj, k_pred = jax.random.split(key, 4)

    params = init_params(k_param, feature_dim, predicate_dim)
    packed = pack_params(params)

    subj = jax.random.normal(k_subj, (batch, 4), jnp.float32)
    obj = jax.random.normal(k_obj, (batch, 4), jnp.float32)
    predi = jax.random.randint(k_pred, (batch,), 0, predicate_dim, jnp.int32)

    logit = simple_spatial_forward(subj, obj, predi,
                                   packed["wbr"], packed["w4r"], packed["vec"])
    logit = jax.block_until_ready(logit)
    assert logit.shape == (batch,)

    # Sanity check against the unfused, bias-including reference (loose
    # tolerance: kernel and XLA reference use default TPU matmul precision).
    ref = reference_forward(subj, obj, predi, params)
    err = float(jnp.max(jnp.abs(logit - ref)))
    assert err < 5e-2, f"max abs err {err}"

    print("KERNEL_OK")
</pallas_src>

<mosaic_0001>
module attributes {stable_mosaic.version = 11 : i64} {
  func.func @spatial_kernel(%arg0: memref<8x128xf32, #tpu.memory_space<vmem>>, %arg1: memref<1x128xi32, #tpu.memory_space<vmem>>, %arg2: memref<96x16xf32, #tpu.memory_space<vmem>>, %arg3: memref<16x96xf32, #tpu.memory_space<vmem>>, %arg4: memref<96x8xf32, #tpu.memory_space<vmem>>, %arg5: memref<1x128xf32, #tpu.memory_space<vmem>>) attributes {dimension_semantics = [], scalar_prefetch = 0 : i64, scratch_operands = 0 : i64, tpu.core_type = #tpu.core_type<tc>} {
    %c0 = arith.constant 0 : index
    %c0_0 = arith.constant 0 : index
    %0 = vector.load %arg4[%c0, %c0_0] : memref<96x8xf32, #tpu.memory_space<vmem>>, vector<96x8xf32>
    %c0_1 = arith.constant 0 : index
    %c0_2 = arith.constant 0 : index
    %1 = vector.load %arg1[%c0_1, %c0_2] : memref<1x128xi32, #tpu.memory_space<vmem>>, vector<1x128xi32>
    %2 = tpu.iota {dimensions = array<i32: 0>} : vector<8x128xi32>
    %3 = vector.broadcast %1 : vector<1x128xi32> to vector<8x128xi32>
    %4 = arith.cmpi eq, %2, %3 : vector<8x128xi32>
    %5 = arith.extui %4 : vector<8x128xi1> to vector<8x128xi32>
    %6 = arith.sitofp %5 : vector<8x128xi32> to vector<8x128xf32>
    %c0_3 = arith.constant 0 : index
    %c0_4 = arith.constant 0 : index
    %7 = vector.load %arg0[%c0_3, %c0_4] : memref<8x128xf32, #tpu.memory_space<vmem>>, vector<8x128xf32>
    %8 = tpu.concatenate %7, %6 in 0 : vector<8x128xf32>, vector<8x128xf32> -> vector<16x128xf32>
    %c0_5 = arith.constant 0 : index
    %c0_6 = arith.constant 0 : index
    %9 = vector.load %arg2[%c0_5, %c0_6] : memref<96x16xf32, #tpu.memory_space<vmem>>, vector<96x16xf32>
    %cst = arith.constant dense<0.000000e+00> : vector<96x128xf32>
    %10 = tpu.matmul %9, %8, %cst {dimension_numbers = #tpu.dot_dimension_numbers<[1], [0], [0], [1], [0, 0, 1, 1], [], []>} : vector<96x16xf32>, vector<16x128xf32>, vector<96x128xf32> -> vector<96x128xf32>
    %11 = vector.extract_strided_slice %0 {offsets = [0, 0], sizes = [96, 1], strides = [1, 1]} : vector<96x8xf32> to vector<96x1xf32>
    %12 = vector.extract_strided_slice %0 {offsets = [0, 1], sizes = [96, 1], strides = [1, 1]} : vector<96x8xf32> to vector<96x1xf32>
    %cst_7 = arith.constant dense<0.000000e+00> : vector<96xf32>
    %13 = vector.multi_reduction <add>, %10, %cst_7 [1] : vector<96x128xf32> to vector<96xf32>
    %14 = vector.shape_cast %13 : vector<96xf32> to vector<96x1xf32>
    %15 = arith.mulf %10, %10 : vector<96x128xf32>
    %cst_8 = arith.constant dense<0.000000e+00> : vector<96xf32>
    %16 = vector.multi_reduction <add>, %15, %cst_8 [1] : vector<96x128xf32> to vector<96xf32>
    %17 = vector.shape_cast %16 : vector<96xf32> to vector<96x1xf32>
    %cst_9 = arith.constant 1.250000e-01 : f32
    %18 = vector.broadcast %cst_9 : f32 to vector<96x1xf32>
    %19 = arith.mulf %14, %18 : vector<96x1xf32>
    %cst_10 = arith.constant 1.250000e-01 : f32
    %20 = vector.broadcast %cst_10 : f32 to vector<96x1xf32>
    %21 = arith.mulf %17, %20 : vector<96x1xf32>
    %22 = arith.mulf %19, %19 : vector<96x1xf32>
    %23 = arith.subf %21, %22 : vector<96x1xf32>
    %cst_11 = arith.constant 0.000000e+00 : f32
    %24 = vector.broadcast %cst_11 : f32 to vector<96x1xf32>
    %25 = arith.maximumf %23, %24 : vector<96x1xf32>
    %cst_12 = arith.constant 9.99999974E-6 : f32
    %26 = vector.broadcast %cst_12 : f32 to vector<96x1xf32>
    %27 = arith.addf %25, %26 : vector<96x1xf32>
    %28 = math.rsqrt %27 : vector<96x1xf32>
    %29 = arith.mulf %28, %11 : vector<96x1xf32>
    %30 = arith.mulf %19, %29 : vector<96x1xf32>
    %31 = arith.subf %12, %30 : vector<96x1xf32>
    %32 = vector.broadcast %29 : vector<96x1xf32> to vector<96x128xf32>
    %33 = arith.mulf %10, %32 : vector<96x128xf32>
    %34 = vector.broadcast %31 : vector<96x1xf32> to vector<96x128xf32>
    %35 = arith.addf %33, %34 : vector<96x128xf32>
    %cst_13 = arith.constant 0.000000e+00 : f32
    %36 = vector.broadcast %cst_13 : f32 to vector<96x128xf32>
    %37 = arith.maximumf %35, %36 : vector<96x128xf32>
    %c0_14 = arith.constant 0 : index
    %c0_15 = arith.constant 0 : index
    %38 = vector.load %arg3[%c0_14, %c0_15] : memref<16x96xf32, #tpu.memory_space<vmem>>, vector<16x96xf32>
    %cst_16 = arith.constant dense<0.000000e+00> : vector<16x128xf32>
    %39 = tpu.matmul %38, %37, %cst_16 {dimension_numbers = #tpu.dot_dimension_numbers<[1], [0], [0], [1], [0, 0, 1, 1], [], []>} : vector<16x96xf32>, vector<96x128xf32>, vector<16x128xf32> -> vector<16x128xf32>
    %40 = tpu.iota {dimensions = array<i32: 1>} : vector<1x128xi32>
    %c8_i32 = arith.constant 8 : i32
    %41 = vector.broadcast %c8_i32 : i32 to vector<1x128xi32>
    %42 = arith.cmpi slt, %40, %41 : vector<1x128xi32>
    %cst_17 = arith.constant 0.000000e+00 : f32
    %43 = vector.shape_cast %42 : vector<1x128xi1> to vector<1x128xi1>
    %44 = vector.broadcast %43 : vector<1x128xi1> to vector<16x128xi1>
    %45 = vector.broadcast %cst_17 : f32 to vector<16x128xf32>
    %46 = arith.select %44, %39, %45 : vector<16x128xi1>, vector<16x128xf32>
    %47 = vector.extract_strided_slice %0 {offsets = [0, 2], sizes = [16, 1], strides = [1, 1]} : vector<96x8xf32> to vector<16x1xf32>
    %48 = vector.extract_strided_slice %0 {offsets = [0, 3], sizes = [16, 1], strides = [1, 1]} : vector<96x8xf32> to vector<16x1xf32>
    %cst_18 = arith.constant dense<0.000000e+00> : vector<16xf32>
    %49 = vector.multi_reduction <add>, %46, %cst_18 [1] : vector<16x128xf32> to vector<16xf32>
    %50 = vector.shape_cast %49 : vector<16xf32> to vector<16x1xf32>
    %51 = arith.mulf %46, %46 : vector<16x128xf32>
    %cst_19 = arith.constant dense<0.000000e+00> : vector<16xf32>
    %52 = vector.multi_reduction <add>, %51, %cst_19 [1] : vector<16x128xf32> to vector<16xf32>
    %53 = vector.shape_cast %52 : vector<16xf32> to vector<16x1xf32>
    %cst_20 = arith.constant 1.250000e-01 : f32
    %54 = vector.broadcast %cst_20 : f32 to vector<16x1xf32>
    %55 = arith.mulf %50, %54 : vector<16x1xf32>
    %cst_21 = arith.constant 1.250000e-01 : f32
    %56 = vector.broadcast %cst_21 : f32 to vector<16x1xf32>
    %57 = arith.mulf %53, %56 : vector<16x1xf32>
    %58 = arith.mulf %55, %55 : vector<16x1xf32>
    %59 = arith.subf %57, %58 : vector<16x1xf32>
    %cst_22 = arith.constant 0.000000e+00 : f32
    %60 = vector.broadcast %cst_22 : f32 to vector<16x1xf32>
    %61 = arith.maximumf %59, %60 : vector<16x1xf32>
    %cst_23 = arith.constant 9.99999974E-6 : f32
    %62 = vector.broadcast %cst_23 : f32 to vector<16x1xf32>
    %63 = arith.addf %61, %62 : vector<16x1xf32>
    %64 = math.rsqrt %63 : vector<16x1xf32>
    %65 = arith.mulf %64, %47 : vector<16x1xf32>
    %66 = arith.mulf %55, %65 : vector<16x1xf32>
    %67 = arith.subf %48, %66 : vector<16x1xf32>
    %68 = vector.broadcast %65 : vector<16x1xf32> to vector<16x128xf32>
    %69 = arith.mulf %46, %68 : vector<16x128xf32>
    %70 = vector.broadcast %67 : vector<16x1xf32> to vector<16x128xf32>
    %71 = arith.addf %69, %70 : vector<16x128xf32>
    %cst_24 = arith.constant 0.000000e+00 : f32
    %72 = vector.broadcast %cst_24 : f32 to vector<16x128xf32>
    %73 = arith.maximumf %71, %72 : vector<16x128xf32>
    %74 = vector.extract_strided_slice %0 {offsets = [0, 4], sizes = [16, 1], strides = [1, 1]} : vector<96x8xf32> to vector<16x1xf32>
    %75 = vector.extract_strided_slice %0 {offsets = [0, 5], sizes = [1, 1], strides = [1, 1]} : vector<96x8xf32> to vector<1x1xf32>
    %76 = vector.broadcast %74 : vector<16x1xf32> to vector<16x128xf32>
    %77 = arith.mulf %73, %76 : vector<16x128xf32>
    %cst_25 = arith.constant dense<0.000000e+00> : vector<128xf32>
    %78 = vector.multi_reduction <add>, %77, %cst_25 [0] : vector<16x128xf32> to vector<128xf32>
    %79 = vector.shape_cast %78 : vector<128xf32> to vector<1x128xf32>
    %80 = vector.broadcast %75 : vector<1x1xf32> to vector<1x128xf32>
    %81 = arith.addf %79, %80 : vector<1x128xf32>
    %c0_26 = arith.constant 0 : index
    %c0_27 = arith.constant 0 : index
    %82 = vector.load %arg5[%c0_26, %c0_27] : memref<1x128xf32, #tpu.memory_space<vmem>>, vector<1x128xf32>
    tpu.vector_store %arg5[%c0_26, %c0_27], %81 {strides = array<i32>} : memref<1x128xf32, #tpu.memory_space<vmem>>, vector<1x128xf32>,
    return
  }
}

</mosaic_0001>

<bundles_post_ra>
// kernel: simple_spatial_forward.1
= control target key start
LH: loop header
LB: loop body
LE: loop exit
PB: predicated region body
PF: predicated region fallthrough
CT: control target
= control target key end

     0   :  { %v33_v0 = vlaneseq  ;;  %v855_v4 = vmov 1.0   ;;  %vm52_vm1 = vcmask 130048   ;;  %s856_s20 = smov 1   ;;  %s1315_s1 = inlined_call_operand.vmem [shape: s32[1,128], index: 1, kind: input, shape index: {}]   ;;  %s1316_s0 = inlined_call_operand.vmem [shape: f32[8,128], index: 0, kind: input, shape index: {}]   ;;  %s1317_s2 = inlined_call_operand.vmem [shape: f32[96,16], index: 2, kind: input, shape index: {}]   ;;  %s1318_s4 = inlined_call_operand.vmem [shape: f32[96,8], index: 4, kind: input, shape index: {}]   ;;  %s1319_s3 = inlined_call_operand.vmem [shape: f32[16,96], index: 3, kind: input, shape index: {}]   ;;  %s1320_s5 = inlined_call_operand.vmem [shape: f32[1,128], index: 5, kind: output, shape index: {}]  }
   0x1   :  { %v826_v1 = vld [vmem:[%s1315_s1] ss:$0 sm:$0xff]  ;;  %v49_v7 = vld [vmem:[%s1317_s2 + $0x48] sm:$0xff]  ;;  %v50_v10 = vld [vmem:[%s1317_s2 + $0x50] sm:$0xff] }
   0x2   :  { %v34_v2 = vshrl.u32 %v33_v0, 7  ;;  %v39_v3 = vld [vmem:[%s1316_s0] sm:$0xff]  ;;  %v41_v8 = vld [vmem:[%s1317_s2 + $0x8] sm:$0xff]  ;;  %v42_v11 = vld [vmem:[%s1317_s2 + $0x10] sm:$0xff] }
   0x3   :  { %v40_v5 = vld [vmem:[%s1317_s2] sm:$0xff]  ;;  %v45_v9 = vld [vmem:[%s1317_s2 + $0x28] sm:$0xff]  ;;  %v51_v12 = vld [vmem:[%s1317_s2 + $0x58] sm:$0xff] }
   0x4   :  { %vm36_vm0 = vcmp.eq.s32.totalorder %v34_v2, %v826_v1  ;;  %v44_v6 = vld [vmem:[%s1317_s2 + $0x20] sm:$0xff]  ;;  %v46_v13 = vld [vmem:[%s1317_s2 + $0x30] sm:$0xff]  ;;  %v43_v14 = vld [vmem:[%s1317_s2 + $0x18] sm:$0xff] }
   0x5   :  { %785 = vmatpush.msk.msra.mxu0 %vm36_vm0, %v855_v4  ;;  %800 = vmatpush.msk.msra.mxu2 %vm36_vm0, %v855_v4  ;;  %v47_v15 = vld [vmem:[%s1317_s2 + $0x38] sm:$0xff]  ;;  %v48_v16 = vld [vmem:[%s1317_s2 + $0x40] sm:$0xff] }
   0x6   :  { %801 = vmatpush.msk.msra.mxu3 %vm36_vm0, %v855_v4 }
   0x7   :  { %104 = vmatpush.msra.mxu0 %v39_v3  ;;  %802 = vmatpush.msra.mxu2 %v39_v3 }
   0x8   :  { %803 = vmatpush.msra.mxu3 %v39_v3  ;;  %786 = vmatmul.msk.f32.vlgmr.msra.gmra.mxu0 %vm52_vm1, %v40_v5 }
   0x9   :  { %790 = vmatmul.msk.f32.vlgmr.msra.gmra.mxu2 %vm52_vm1, %v44_v6  ;;  %795 = vmatmul.msk.f32.vlgmr.msra.gmra.mxu3 %vm52_vm1, %v49_v7 }
  0x10   :  { %787 = vmatmul.msk.f32.gmra.mxu0 %vm52_vm1, %v41_v8 }
  0x11   :  { %791 = vmatmul.msk.f32.gmra.mxu2 %vm52_vm1, %v45_v9  ;;  %796 = vmatmul.msk.f32.gmra.mxu3 %vm52_vm1, %v50_v10 }
  0x18   :  { %788 = vmatmul.msk.f32.gmra.mxu0 %vm52_vm1, %v42_v11 }
  0x19   :  { %797 = vmatmul.msk.f32.gmra.mxu3 %vm52_vm1, %v51_v12  ;;  %792 = vmatmul.msk.f32.gmra.mxu2 %vm52_vm1, %v46_v13 }
  0x20   :  { %789 = vmatmul.msk.f32.gmra.mxu0 %vm52_vm1, %v43_v14 }
  0x21   :  { %793 = vmatmul.msk.f32.gmra.mxu2 %vm52_vm1, %v47_v15 }
  0x29   :  { %794 = vmatmul.msk.f32.gmra.mxu2 %vm52_vm1, %v48_v16 }
  0x85   :  { %v948_v17 = vpop.f32.mrf.mxu0 }
  0x86   :  { %142 = vadd.xlane.f32.xlu0 %v948_v17  ;;  %v166_v18 = vmul.f32 %v948_v17, %v948_v17 }
  0x88   :  { %178 = vadd.xlane.f32.xlu2 %v166_v18 }
  0x8c   :  { %v953_v19 = vpop.f32.mrf.mxu2  ;;  %v955_v20 = vpop.f32.mrf.mxu3 }
  0x8d   :  { %160 = vadd.xlane.f32.xlu1 %v955_v20  ;;  %v175_v21 = vmul.f32 %v955_v20, %v955_v20  ;;  %v170_v25 = vmul.f32 %v953_v19, %v953_v19  ;;  %v974_v27 = vpop.f32.mrf.mxu0 }
  0x8e   :  { %v167_v31 = vmul.f32 %v974_v27, %v974_v27 }
  0x8f   :  { %196 = vadd.xlane.f32.xlu0 %v175_v21  ;;  %v1028_v21 = vld [vmem:[%s1318_s4 + $0x48] sm:$0xff] }
  0x94   :  { %v960_v22 = vpop.f32.mrf.mxu2  ;;  %v962_v23 = vpop.f32.mrf.mxu3 }
  0x95   :  { %150 = vadd.xlane.f32.xlu1 %v953_v19  ;;  %152 = vadd.xlane.f32.xlu2 %v960_v22  ;;  %v176_v24 = vmul.f32 %v962_v23, %v962_v23  ;;  %v171_v28 = vmul.f32 %v960_v22, %v960_v22  ;;  %v982_v30 = vpop.f32.mrf.mxu0 }
  0x96   :  { %v168_v35 = vmul.f32 %v982_v30, %v982_v30 }
  0x97   :  { %162 = vadd.xlane.f32.xlu0 %v962_v23 }
  0x9c   :  { %v971_v26 = vpop.f32.mrf.mxu3  ;;  %v978_v29 = vpop.f32.mrf.mxu2 }
  0x9d   :  { %186 = vadd.xlane.f32.xlu1 %v170_v25  ;;  %198 = vadd.xlane.f32.xlu2 %v176_v24  ;;  %v172_v32 = vmul.f32 %v978_v29, %v978_v29  ;;  %v177_v34 = vmul.f32 %v971_v26, %v971_v26  ;;  %v995_v36 = vpop.f32.mrf.mxu0 }
  0x9e   :  { %v169_v38 = vmul.f32 %v995_v36, %v995_v36 }
  0x9f   :  { %164 = vadd.xlane.f32.xlu0 %v971_v26 }
  0xa4   :  { %v989_v33 = vpop.f32.mrf.mxu2 }
  0xa5   :  { %188 = vadd.xlane.f32.xlu2 %v171_v28  ;;  %144 = vadd.xlane.f32.xlu1 %v974_v27  ;;  %v173_v39 = vmul.f32 %v989_v33, %v989_v33 }
  0xa7   :  { %154 = vadd.xlane.f32.xlu0 %v978_v29 }
  0xac   :  { %v998_v37 = vpop.f32.mrf.mxu2 }
  0xad   :  { %180 = vadd.xlane.f32.xlu1 %v167_v31  ;;  %146 = vadd.xlane.f32.xlu2 %v982_v30  ;;  %v174_v40 = vmul.f32 %v998_v37, %v998_v37 }
  0xaf   :  { %190 = vadd.xlane.f32.xlu0 %v172_v32 }
  0xb5   :  { %200 = vadd.xlane.f32.xlu1 %v177_v34  ;;  %182 = vadd.xlane.f32.xlu2 %v168_v35 }
  0xb7   :  { %148 = vadd.xlane.f32.xlu0 %v995_v36 }
  0xbd   :  { %156 = vadd.xlane.f32.xlu1 %v989_v33  ;;  %158 = vadd.xlane.f32.xlu2 %v998_v37 }
  0xbf   :  { %184 = vadd.xlane.f32.xlu0 %v169_v38 }
  0xc5   :  { %192 = vadd.xlane.f32.xlu1 %v173_v39  ;;  %194 = vadd.xlane.f32.xlu2 %v174_v40 }
  0xf9   :  { %v143_v41 = vpop.xlane.xlu0 %142 }
  0xfa   :  { %v1020_v11 = vmul.f32 0.125, %v143_v41 }
  0xfb   :  { %v179_v42 = vpop.xlane.xlu2 %178 }
  0xfc   :  { %v226_v28 = vmul.f32 %v1020_v11, %v1020_v11  ;;  %v214_v32 = vmul.f32 0.125, %v179_v42 }
 0x100   :  { %v161_v43 = vpop.xlane.xlu1 %160 }
 0x101   :  { %v211_v44 = vmul.f32 0.125, %v161_v43 }
 0x102   :  { %v197_v45 = vpop.xlane.xlu0 %196 }
 0x103   :  { %v235_v46 = vmul.f32 %v211_v44, %v211_v44  ;;  %v223_v47 = vmul.f32 0.125, %v197_v45 }
 0x105   :  { %v247_v48 = vsub.f32 %v223_v47, %v235_v46 }
 0x107   :  { %v259_v49 = vmax.f32 %v247_v48, 0.0  ;;  %v238_v48 = vsub.f32 %v214_v32, %v226_v28  ;;  %v1077_v32 = vld [vmem:[%s1318_s4 + $0x50] sm:$0xff] }
 0x108   :  { %v151_v50 = vpop.xlane.xlu1 %150  ;;  %v153_v51 = vpop.xlane.xlu2 %152 }
 0x109   :  { %v271_v52 = vadd.f32 1e-05, %v259_v49  ;;  %v1010_v55 = vmul.f32 0.125, %v151_v50  ;;  %v1016_v5 = vmul.f32 0.125, %v153_v51 }
 0x10a   :  { %v163_v53 = vpop.xlane.xlu0 %162 }
 0x10b   :  { %827 = vrsqrt.f32 %v271_v52  ;;  %v1008_v54 = vmul.f32 0.125, %v163_v53  ;;  %v230_v60 = vmul.f32 %v1010_v55, %v1010_v55  ;;  %v231_v15 = vmul.f32 %v1016_v5, %v1016_v5 }
 0x10c   :  { %vm370_vm3 = vweird.f32 %v271_v52 }
 0x10d   :  { %v236_v56 = vmul.f32 %v1008_v54, %v1008_v54 }
 0x110   :  { %v187_v57 = vpop.xlane.xlu1 %186  ;;  %v199_v58 = vpop.xlane.xlu2 %198 }
 0x111   :  { %v828_v59 = vpop.eup %827  ;;  %v218_v61 = vmul.f32 0.125, %v187_v57  ;;  %v224_v62 = vmul.f32 0.125, %v199_v58  ;;  %v250_v58 = vmax.f32 %v238_v48, 0.0 }
 0x112   :  { %v365_v63 = vmul.f32 %v828_v59, %v271_v52  ;;  %v165_v1 = vpop.xlane.xlu0 %164  ;;  %vm371_vm2 = vweird.f32 %v828_v59 }
 0x113   :  { %v242_v2 = vsub.f32 %v218_v61, %v230_v60  ;;  %v248_v3 = vsub.f32 %v224_v62, %v236_v56  ;;  %vm372_vm4 = vmor %vm370_vm3, %vm371_vm2  ;;  %v1045_v51 = vmul.f32 0.125, %v165_v1 }
 0x114   :  { %v366_v4 = vmul.f32 %v828_v59, %v365_v63 }
 0x115   :  { %v254_v6 = vmax.f32 %v242_v2, 0.0  ;;  %v260_v7 = vmax.f32 %v248_v3, 0.0  ;;  %v237_v62 = vmul.f32 %v1045_v51, %v1045_v51 }
 0x116   :  { %v367_v8 = vmul.f32 0.5, %v366_v4 }
 0x117   :  { %v266_v9 = vadd.f32 1e-05, %v254_v6  ;;  %v1018_v10 = vadd.f32 1e-05, %v260_v7 }
 0x118   :  { %v368_v12 = vsub.f32 1.5, %v367_v8  ;;  %v189_v13 = vpop.xlane.xlu2 %188  ;;  %v145_v14 = vpop.xlane.xlu1 %144 }
 0x119   :  { %829 = vrsqrt.f32 %v266_v9  ;;  %v219_v16 = vmul.f32 0.125, %v189_v13  ;;  %v1047_v57 = vmul.f32 0.125, %v145_v14  ;;  %vm320_vm5 = vweird.f32 %v266_v9 }
 0x11a   :  { %831 = vrsqrt.f32 %v1018_v10  ;;  %v155_v18 = vpop.xlane.xlu0 %154  ;;  %v369_v24 = vmul.f32 %v828_v59, %v368_v12  ;;  %vm380_vm9 = vweird.f32 %v1018_v10 }
 0x11b   :  { %v243_v25 = vsub.f32 %v219_v16, %v231_v15  ;;  %v1032_v35 = vmul.f32 0.125, %v155_v18  ;;  %v227_v7 = vmul.f32 %v1047_v57, %v1047_v57 }
 0x11c   :  { %v373_v31 = vsel %vm372_vm4, %v828_v59, %v369_v24  ;;  %v1068_v24 = vld [vmem:[%s1318_s4 + $0x20] sm:$0xff] }
 0x11d   :  { %v255_v34 = vmax.f32 %v243_v25, 0.0  ;;  %v1035_v38 = vmul.f32 %v373_v31, %v1028_v21  ;;  %v232_v42 = vmul.f32 %v1032_v35, %v1032_v35  ;;  %v1070_v25 = vadd.f32 1e-05, %v250_v58 }
 0x11f   :  { %v830_v39 = vpop.eup %829  ;;  %v1037_v40 = vadd.f32 1e-05, %v255_v34  ;;  %v415_v41 = vmul.f32 %v1035_v38, %v211_v44 }
 0x120   :  { %v832_v43 = vpop.eup %831  ;;  %v315_v45 = vmul.f32 %v830_v39, %v266_v9  ;;  %v181_v46 = vpop.xlane.xlu1 %180  ;;  %vm321_vm6 = vweird.f32 %v830_v39 }
 0x121   :  { %v147_v47 = vpop.xlane.xlu2 %146  ;;  %v375_v49 = vmul.f32 %v832_v43, %v1018_v10  ;;  %833 = vrsqrt.f32 %v1037_v40  ;;  %448 = vrot.lane.b32.xlu2 %v415_v41, %s856_s20  ;;  %v215_v1 = vmul.f32 0.125, %v181_v46  ;;  %vm381_vm7 = vweird.f32 %v832_v43  ;;  %vm1059_vm8 = vmor %vm320_vm5, %vm321_vm6 }
 0x122   :  { %v316_v50 = vmul.f32 %v830_v39, %v315_v45  ;;  %v191_v52 = vpop.xlane.xlu0 %190  ;;  %v1053_v3 = vmul.f32 0.125, %v147_v47  ;;  %vm382_vm10 = vmor %vm380_vm9, %vm381_vm7  ;;  %vm330_vm12 = vweird.f32 %v1037_v40 }
 0x123   :  { %v376_v44 = vmul.f32 %v832_v43, %v375_v49  ;;  %v220_v53 = vmul.f32 0.125, %v191_v52  ;;  %v239_v41 = vsub.f32 %v215_v1, %v227_v7 }
 0x124   :  { %v317_v56 = vmul.f32 0.5, %v316_v50  ;;  %v228_v45 = vmul.f32 %v1053_v3, %v1053_v3 }
 0x125   :  { %v377_v59 = vmul.f32 0.5, %v376_v44  ;;  %v244_v60 = vsub.f32 %v220_v53, %v232_v42  ;;  %v251_v53 = vmax.f32 %v239_v41, 0.0 }
 0x126   :  { %v318_v61 = vsub.f32 1.5, %v317_v56 }
 0x127   :  { %v1051_v63 = vpop.eup %833  ;;  %v378_v2 = vsub.f32 1.5, %v377_v59  ;;  %v256_v4 = vmax.f32 %v244_v60, 0.0  ;;  %v1109_v1 = vadd.f32 1e-05, %v251_v53 }
 0x128   :  { %v325_v6 = vmul.f32 %v1051_v63, %v1037_v40  ;;  %v201_v8 = vpop.xlane.xlu1 %200  ;;  %v319_v12 = vmul.f32 %v830_v39, %v318_v61  ;;  %vm331_vm11 = vweird.f32 %v1051_v63 }
 0x129   :  { %v183_v9 = vpop.xlane.xlu2 %182  ;;  %v1063_v14 = vadd.f32 1e-05, %v256_v4  ;;  %v225_v15 = vmul.f32 0.125, %v201_v8  ;;  %v379_v18 = vmul.f32 %v832_v43, %v378_v2  ;;  %vm332_vm13 = vmor %vm330_vm12, %vm331_vm11 }
 0x12a   :  { %v216_v16 = vmul.f32 0.125, %v183_v9  ;;  %v326_v28 = vmul.f32 %v1051_v63, %v325_v6  ;;  %v149_v31 = vpop.xlane.xlu0 %148  ;;  %v323_v34 = vsel %vm1059_vm8, %v830_v39, %v319_v12  ;;  %v1114_v6 = vld [vmem:[%s1318_s4 + $0x28] sm:$0xff]  ;;  %vm280_vm8 = vweird.f32 %v1070_v25 }
 0x12b   :  { %835 = vrsqrt.f32 %v1063_v14  ;;  %v249_v10 = vsub.f32 %v225_v15, %v237_v62  ;;  %v383_v47 = vsel %vm382_vm10, %v832_v43, %v379_v18  ;;  %v1086_v48 = vmul.f32 %v323_v34, %v1068_v24 }
 0x12c   :  { %v327_v46 = vmul.f32 0.5, %v326_v28  ;;  %v240_v42 = vsub.f32 %v216_v16, %v228_v45  ;;  %v1088_v50 = vmul.f32 0.125, %v149_v31  ;;  %v1091_v39 = vmul.f32 %v383_v47, %v1077_v32 }
 0x12d   :  { %v261_v49 = vmax.f32 %v249_v10, 0.0  ;;  %837 = vrsqrt.f32 %v1070_v25  ;;  %v410_v44 = vmul.f32 %v1086_v48, %v1010_v55  ;;  %vm340_vm14 = vweird.f32 %v1063_v14 }
 0x12e   :  { %v328_v52 = vsub.f32 1.5, %v327_v46  ;;  %v416_v43 = vmul.f32 %v1091_v39, %v1008_v54  ;;  %v252_v62 = vmax.f32 %v240_v42, 0.0  ;;  %v229_v55 = vmul.f32 %v1088_v50, %v1088_v50 }
 0x12f   :  { %v1096_v56 = vadd.f32 1e-05, %v261_v49  ;;  %438 = vrot.lane.b32.xlu2 %v410_v44, %s856_s20 }
 0x130   :  { %v157_v58 = vpop.xlane.xlu1 %156  ;;  %v329_v60 = vmul.f32 %v1051_v63, %v328_v52  ;;  %450 = vrot.lane.b32.xlu1 %v416_v43, %s856_s20  ;;  %v1119_v12 = vadd.f32 1e-05, %v252_v62 }
 0x131   :  { %v159_v59 = vpop.xlane.xlu2 %158  ;;  %v836_v61 = vpop.eup %835  ;;  %839 = vrsqrt.f32 %v1096_v56  ;;  %v1121_v40 = vmul.f32 0.125, %v157_v58  ;;  %vm390_vm2 = vweird.f32 %v1096_v56 }
 0x132   :  { %v335_v54 = vmul.f32 %v836_v61, %v1063_v14  ;;  %v185_v2 = vpop.xlane.xlu0 %184  ;;  %v333_v9 = vsel %vm332_vm13, %v1051_v63, %v329_v60  ;;  %v1123_v16 = vmul.f32 0.125, %v159_v59  ;;  %841 = vrsqrt.f32 %v1109_v1 }
 0x133   :  { %v217_v4 = vmul.f32 0.125, %v185_v2  ;;  %v1116_v7 = vpop.eup %837  ;;  %v1126_v18 = vmul.f32 %v333_v9, %v1114_v6  ;;  %vm341_vm15 = vweird.f32 %v836_v61  ;;  %843 = vrsqrt.f32 %v1119_v12 }
 0x134   :  { %v336_v8 = vmul.f32 %v836_v61, %v335_v54  ;;  %v275_v31 = vmul.f32 %v1116_v7, %v1070_v25  ;;  %v233_v47 = vmul.f32 %v1121_v40, %v1121_v40  ;;  %v234_v44 = vmul.f32 %v1123_v16, %v1123_v16  ;;  %vm342_vm0 = vmor %vm340_vm14, %vm341_vm15 }
 0x135   :  { %v241_v13 = vsub.f32 %v217_v4, %v229_v55  ;;  %v411_v45 = vmul.f32 %v1126_v18, %v1016_v5  ;;  %v1146_v5 = vld [vmem:[%s1318_s4 + $0x30] sm:$0xff]  ;;  %vm281_vm6 = vweird.f32 %v1116_v7 }
 0x136   :  { %v337_v15 = vmul.f32 0.5, %v336_v8  ;;  %v276_v4 = vmul.f32 %v1116_v7, %v275_v31  ;;  %v1169_v31 = vld [vmem:[%s1318_s4 + $0x58] sm:$0xff]  ;;  %vm1198_vm9 = vmor %vm280_vm8, %vm281_vm6  ;;  %vm636_vm6 = vcmask 785408  }
 0x137   :  { %v840_v28 = vpop.eup %839  ;;  %v253_v63 = vmax.f32 %v241_v13, 0.0  ;;  %440 = vrot.lane.b32.xlu0 %v411_v45, %s856_s20 }
 0x138   :  { %v338_v34 = vsub.f32 1.5, %v337_v15  ;;  %v385_v41 = vmul.f32 %v840_v28, %v1096_v56  ;;  %v193_v10 = vpop.xlane.xlu1 %192  ;;  %v1152_v55 = vpop.eup %841  ;;  %vm391_vm1 = vweird.f32 %v840_v28  ;;  %v277_v45 = vmul.f32 0.5, %v276_v4 }
 0x139   :  { %v195_v46 = vpop.xlane.xlu2 %194  ;;  %v1138_v49 = vadd.f32 1e-05, %v253_v63  ;;  %v221_v42 = vmul.f32 0.125, %v193_v10  ;;  %v1158_v13 = vpop.eup %843  ;;  %vm392_vm3 = vmor %vm390_vm2, %vm391_vm1  ;;  %vm291_vm15 = vweird.f32 %v1152_v55  ;;  %vm290_vm2 = vweird.f32 %v1109_v1 }
 0x13a   :  { %v386_v52 = vmul.f32 %v840_v28, %v385_v41  ;;  %v222_v53 = vmul.f32 0.125, %v195_v46  ;;  %v339_v43 = vmul.f32 %v836_v61, %v338_v34  ;;  %v857_v41 = vmov 0  }
 0x13b   :  { %845 = vrsqrt.f32 %v1138_v49  ;;  %v245_v58 = vsub.f32 %v221_v42, %v233_v47  ;;  %813 = vset.pattern.permute.xlu2 %v857_v41  ;;  %814 = vset.pattern.permute.xlu1 %v857_v41  ;;  %v295_v56 = vmul.f32 %v1158_v13, %v1119_v12  ;;  %vm310_vm4 = vweird.f32 %v1138_v49 }
 0x13c   :  { %v387_v59 = vmul.f32 0.5, %v386_v52  ;;  %v246_v60 = vsub.f32 %v222_v53, %v234_v44  ;;  %v343_v62 = vsel %vm342_vm0, %v836_v61, %v339_v43  ;;  %812 = vset.pattern.permute.xlu0 %v857_v41  ;;  %v278_v52 = vsub.f32 1.5, %v277_v45 }
 0x13d   :  { %v257_v54 = vmax.f32 %v245_v58, 0.0  ;;  %v1155_v2 = vmul.f32 %v343_v62, %v1146_v5  ;;  %vm301_vm1 = vweird.f32 %v1158_v13 }
 0x13e   :  { %v388_v8 = vsub.f32 1.5, %v387_v59  ;;  %v258_v9 = vmax.f32 %v246_v60, 0.0  ;;  %v296_v59 = vmul.f32 %v1158_v13, %v295_v56 }
 0x13f   :  { %v269_v14 = vadd.f32 1e-05, %v257_v54  ;;  %v412_v15 = vmul.f32 %v1155_v2, %v1032_v35  ;;  %v285_v35 = vmul.f32 %v1152_v55, %v1109_v1 }
 0x140   :  { %v1162_v63 = vadd.f32 1e-05, %v258_v9  ;;  %v389_v61 = vmul.f32 %v840_v28, %v388_v8 }
 0x141   :  { %v846_v34 = vpop.eup %845  ;;  %847 = vrsqrt.f32 %v269_v14  ;;  %442 = vrot.lane.b32.xlu1 %v412_v15, %s856_s20  ;;  %v286_v44 = vmul.f32 %v1152_v55, %v285_v35  ;;  %v279_v15 = vmul.f32 %v1116_v7, %v278_v52  ;;  %vm350_vm12 = vweird.f32 %v269_v14 }
 0x142   :  { %v305_v10 = vmul.f32 %v846_v34, %v1138_v49  ;;  %849 = vrsqrt.f32 %v1162_v63  ;;  %v393_v46 = vsel %vm392_vm3, %v840_v28, %v389_v61  ;;  %vm311_vm5 = vweird.f32 %v846_v34  ;;  %vm292_vm3 = vmor %vm290_vm2, %vm291_vm15 }
 0x143   :  { %v1181_v42 = vmul.f32 %v393_v46, %v1169_v31  ;;  %v287_v4 = vmul.f32 0.5, %v286_v44  ;;  %v297_v61 = vmul.f32 0.5, %v296_v59  ;;  %vm312_vm7 = vmor %vm310_vm4, %vm311_vm5  ;;  %v283_v52 = vsel %vm1198_vm9, %v1116_v7, %v279_v15  ;;  %v1215_v59 = vld [vmem:[%s1318_s4 + $0x38] sm:$0xff] }
 0x144   :  { %v306_v47 = vmul.f32 %v846_v34, %v305_v10  ;;  %vm360_vm14 = vweird.f32 %v1162_v63  ;;  %vm300_vm4 = vweird.f32 %v1119_v12  ;;  %v22_v12 = vld [vmem:[%s1318_s4 + $0x10] sm:$0xff] }
 0x145   :  { %v417_v43 = vmul.f32 %v1181_v42, %v1045_v51  ;;  %v1194_v51 = vld [vmem:[%s1318_s4 + $0x18] sm:$0xff]  ;;  %vm302_vm5 = vmor %vm300_vm4, %vm301_vm1 }
 0x146   :  { %v307_v53 = vmul.f32 0.5, %v306_v47  ;;  %v288_v47 = vsub.f32 1.5, %v287_v4 }
 0x147   :  { %v848_v58 = vpop.eup %847  ;;  %452 = vrot.lane.b32.xlu0 %v417_v43, %s856_s20 }
 0x148   :  { %v850_v60 = vpop.eup %849  ;;  %v308_v62 = vsub.f32 1.5, %v307_v53  ;;  %v345_v28 = vmul.f32 %v848_v58, %v269_v14  ;;  %vm351_vm10 = vweird.f32 %v848_v58  ;;  %v298_v53 = vsub.f32 1.5, %v297_v61  ;;  %v1238_v61 = vld [vmem:[%s1318_s4 + $0x8] sm:$0xff] }
 0x149   :  { %v355_v54 = vmul.f32 %v850_v60, %v1162_v63  ;;  %vm361_vm11 = vweird.f32 %v850_v60  ;;  %vm352_vm13 = vmor %vm350_vm12, %vm351_vm10 }
 0x14a   :  { %v346_v8 = vmul.f32 %v848_v58, %v345_v28  ;;  %v309_v9 = vmul.f32 %v846_v34, %v308_v62  ;;  %vm362_vm0 = vmor %vm360_vm14, %vm361_vm11 }
 0x14b   :  { %v356_v49 = vmul.f32 %v850_v60, %v355_v54  ;;  %v289_v54 = vmul.f32 %v1152_v55, %v288_v47 }
 0x14c   :  { %v347_v45 = vmul.f32 0.5, %v346_v8  ;;  %v313_v35 = vsel %vm312_vm7, %v846_v34, %v309_v9  ;;  %v1210_v34 = vld [vmem:[%s1318_s4] sm:$0xff]  ;;  %v299_v8 = vmul.f32 %v1158_v13, %v298_v53 }
 0x14d   :  { %v357_v56 = vmul.f32 0.5, %v356_v49  ;;  %v397_v46 = vmul.f32 %v313_v35, %v1194_v51  ;;  %v394_v28 = vmul.f32 %v283_v52, %v1210_v34 }
 0x14e   :  { %v348_v44 = vsub.f32 1.5, %v347_v45 }
 0x14f   :  { %v358_v43 = vsub.f32 1.5, %v357_v56  ;;  %v409_v25 = vmul.f32 %v397_v46, %v1088_v50  ;;  %v1222_v50 = vld [vmem:[%s1318_s4 + $0x40] sm:$0xff]  ;;  %v406_v1 = vmul.f32 %v394_v28, %v1020_v11  ;;  %v858_v11 = vmov 1  }
 0x150   :  { %v349_v62 = vmul.f32 %v848_v58, %v348_v44 }
 0x151   :  { %436 = vrot.lane.b32.xlu1 %v409_v25, %s856_s20  ;;  %v359_v7 = vmul.f32 %v850_v60, %v358_v43 }
 0x152   :  { %v353_v14 = vsel %vm352_vm13, %v848_v58, %v349_v62 }
 0x153   :  { %v401_v63 = vmul.f32 %v353_v14, %v1215_v59  ;;  %v363_v4 = vsel %vm362_vm0, %v850_v60, %v359_v7  ;;  %v293_v60 = vsel %vm292_vm3, %v1152_v55, %v289_v54 }
 0x154   :  { %v402_v9 = vmul.f32 %v363_v4, %v1222_v50 }
 0x155   :  { %v413_v58 = vmul.f32 %v401_v63, %v1121_v40  ;;  %v303_v40 = vsel %vm302_vm5, %v1158_v13, %v299_v8 }
 0x156   :  { %v414_v15 = vmul.f32 %v402_v9, %v1123_v16  ;;  %v395_v16 = vmul.f32 %v293_v60, %v1238_v61  ;;  %v396_v49 = vmul.f32 %v303_v40, %v22_v12 }
 0x157   :  { %444 = vrot.lane.b32.xlu2 %v413_v58, %s856_s20 }
 0x158   :  { %446 = vrot.lane.b32.xlu0 %v414_v15, %s856_s20  ;;  %v407_v45 = vmul.f32 %v395_v16, %v1047_v57  ;;  %v408_v55 = vmul.f32 %v396_v49, %v1053_v3 }
 0x159   :  { %430 = vrot.lane.b32.xlu1 %v406_v1, %s856_s20 }
 0x15f   :  { %432 = vrot.lane.b32.xlu2 %v407_v45, %s856_s20 }
 0x160   :  { %434 = vrot.lane.b32.xlu0 %v408_v55, %s856_s20 }
 0x161   :  { %515 = vperm.xlu1 %814, %v401_v63  }
 0x167   :  { %530 = vperm.xlu2 %813, %v1091_v39  }
 0x168   :  { %535 = vperm.xlu0 %812, %v1181_v42  }
 0x169   :  { %495 = vperm.xlu1 %814, %v397_v46  }
 0x16f   :  { %525 = vperm.xlu2 %813, %v1035_v38  }
 0x170   :  { %520 = vperm.xlu0 %812, %v402_v9  }
 0x171   :  { %490 = vperm.xlu1 %814, %v396_v49  }
 0x177   :  { %510 = vperm.xlu2 %813, %v1155_v2  }
 0x178   :  { %500 = vperm.xlu0 %812, %v1086_v48  }
 0x179   :  { %816 = vset.pattern.permute.xlu1 %v858_v11 }
 0x17b   :  { %v449_v57 = vpop.permute.xlu2 %448 }
 0x17c   :  { %v475_v3 = vsub.f32 %v1028_v21, %v449_v57 }
 0x17f   :  { %505 = vperm.xlu2 %813, %v1126_v18  }
 0x180   :  { %817 = vset.pattern.permute.xlu0 %v858_v11 }
 0x187   :  { %815 = vset.pattern.permute.xlu2 %v858_v11 }
 0x188   :  { %597 = vperm.xlu2 %815, %v475_v3  }
 0x189   :  { %v439_v39 = vpop.permute.xlu2 %438 }
 0x18a   :  { %v470_v13 = vsub.f32 %v1068_v24, %v439_v39 }
 0x190   :  { %572 = vperm.xlu2 %815, %v470_v13  }
 0x1a2   :  { %v451_v38 = vpop.permute.xlu1 %450 }
 0x1a3   :  { %v476_v42 = vsub.f32 %v1077_v32, %v451_v38 }
 0x1a5   :  { %602 = vperm.xlu1 %816, %v476_v42  }
 0x1a9   :  { %v441_v2 = vpop.permute.xlu0 %440 }
 0x1aa   :  { %v471_v48 = vsub.f32 %v1114_v6, %v441_v2 }
 0x1ac   :  { %577 = vperm.xlu2 %815, %v471_v48  }
 0x1b1   :  { %v445_v10 = vpop.permute.xlu2 %444 }
 0x1b2   :  { %v473_v32 = vsub.f32 %v1215_v59, %v445_v10 }
 0x1b3   :  { %v443_v35 = vpop.permute.xlu1 %442 }
 0x1b4   :  { %818 = vset.pattern.permute.xlu2 %v857_v41  ;;  %v472_v24 = vsub.f32 %v1146_v5, %v443_v35 }
 0x1b5   :  { %485 = vperm.xlu2 %818, %v395_v16  }
 0x1b9   :  { %v453_v18 = vpop.permute.xlu0 %452 }
 0x1ba   :  { %v477_v21 = vsub.f32 %v1169_v31, %v453_v18  ;;  %v433_v31 = vpop.permute.xlu2 %432 }
 0x1bb   :  { %v467_v5 = vsub.f32 %v1238_v61, %v433_v31 }
 0x1bc   :  { %607 = vperm.xlu1 %816, %v477_v21  }
 0x1bd   :  { %480 = vperm.xlu2 %818, %v394_v28  }
 0x1c2   :  { %v531_v43 = vpop.permute.xlu2 %530 }
 0x1c3   :  { %v437_v6 = vpop.permute.xlu1 %436  ;;  %v548_v4 = vmul.f32 %v531_v43, %v962_v23 }
 0x1c4   :  { %582 = vperm.xlu1 %816, %v472_v24   ;;  %v469_v47 = vsub.f32 %v1194_v51, %v437_v6 }
 0x1ca   :  { %v447_v56 = vpop.permute.xlu0 %446  ;;  %v526_v25 = vpop.permute.xlu2 %525 }
 0x1cb   :  { %v474_v46 = vsub.f32 %v1222_v50, %v447_v56  ;;  %v431_v52 = vpop.permute.xlu1 %430  ;;  %v547_v15 = vmul.f32 %v526_v25, %v955_v20  ;;  %v634_v25 = vld [vmem:[%s1319_s3] sm:$0xff] }
 0x1cc   :  { %587 = vperm.xlu1 %816, %v473_v32   ;;  %v466_v53 = vsub.f32 %v1210_v34, %v431_v52 }
 0x1cd   :  { %592 = vperm.xlu0 %817, %v474_v46  }
 0x1d2   :  { %v435_v41 = vpop.permute.xlu0 %434  ;;  %v511_v62 = vpop.permute.xlu2 %510 }
 0x1d3   :  { %v468_v44 = vsub.f32 %v22_v12, %v435_v41  ;;  %v516_v59 = vpop.permute.xlu1 %515  ;;  %v544_v20 = vmul.f32 %v511_v62, %v978_v29 }
 0x1d4   :  { %v545_v23 = vmul.f32 %v516_v59, %v989_v33 }
 0x1d5   :  { %567 = vperm.xlu0 %817, %v469_v47   ;;  %562 = vperm.xlu1 %816, %v468_v44  }
 0x1da   :  { %v506_v7 = vpop.permute.xlu2 %505  ;;  %v536_v28 = vpop.permute.xlu0 %535 }
 0x1db   :  { %v496_v50 = vpop.permute.xlu1 %495  ;;  %v549_v8 = vmul.f32 %v536_v28, %v971_v26  ;;  %v543_v42 = vmul.f32 %v506_v7, %v960_v22 }
 0x1dc   :  { %v541_v33 = vmul.f32 %v496_v50, %v995_v36 }
 0x1dd   :  { %552 = vperm.xlu0 %817, %v466_v53   ;;  %557 = vperm.xlu1 %816, %v467_v5  }
 0x1e2   :  { %v598_v51 = vpop.permute.xlu2 %597  ;;  %v521_v63 = vpop.permute.xlu0 %520 }
 0x1e3   :  { %v491_v14 = vpop.permute.xlu1 %490  ;;  %v619_v12 = vadd.f32 %v598_v51, %v547_v15  ;;  %v546_v26 = vmul.f32 %v521_v63, %v998_v37  ;;  %v859_v51 = vmov 2  }
 0x1e4   :  { %v540_v29 = vmul.f32 %v491_v14, %v982_v30  ;;  %819 = vset.pattern.permute.xlu2 %v859_v51 }
 0x1e5   :  { %v631_v49 = vmax.f32 %v619_v12, 0.0  ;;  %820 = vset.pattern.permute.xlu0 %v859_v51 }
 0x1ea   :  { %v573_v9 = vpop.permute.xlu2 %572  ;;  %v501_v45 = vpop.permute.xlu0 %500 }
 0x1eb   :  { %v542_v2 = vmul.f32 %v501_v45, %v953_v19 }
 0x1ed   :  { %v614_v24 = vadd.f32 %v573_v9, %v542_v2 }
 0x1ef   :  { %v626_v22 = vmax.f32 %v614_v24, 0.0 }
 0x206   :  { %v578_v55 = vpop.permute.xlu2 %577 }
 0x207   :  { %v615_v21 = vadd.f32 %v578_v55, %v543_v42 }
 0x209   :  { %v627_v32 = vmax.f32 %v615_v21, 0.0 }
 0x20f   :  { %v486_v38 = vpop.permute.xlu2 %485 }
 0x210   :  { %v539_v47 = vmul.f32 %v486_v38, %v974_v27  ;;  %v667_v27 = vand.u32 127, %v33_v0 }
 0x212   :  { %vm668_vm7 = vcmp.lt.s32.totalorder %v667_v27, 8 }
 0x217   :  { %v603_v54 = vpop.permute.xlu1 %602  ;;  %v481_v19 = vpop.permute.xlu2 %480 }
 0x218   :  { %v620_v60 = vadd.f32 %v603_v54, %v548_v4  ;;  %v538_v36 = vmul.f32 %v481_v19, %v948_v17  ;;  %v635_v17 = vld [vmem:[%s1319_s3 + $0x8] sm:$0xff] }
 0x21a   :  { %v632_v16 = vmax.f32 %v620_v60, 0.0 }
 0x22e   :  { %v608_v58 = vpop.permute.xlu1 %607 }
 0x22f   :  { %v621_v1 = vadd.f32 %v608_v58, %v549_v8 }
 0x231   :  { %v633_v40 = vmax.f32 %v621_v1, 0.0 }
 0x233   :  { %647 = vmatpush.msra.mxu1 %v633_v40 }
 0x235   :  { %648 = vmatpush.msra.mxu1 %v632_v16 }
 0x236   :  { %v583_v11 = vpop.permute.xlu1 %582 }
 0x237   :  { %649 = vmatpush.msra.mxu1 %v631_v49  ;;  %v616_v48 = vadd.f32 %v583_v11, %v544_v20 }
 0x239   :  { %v628_v37 = vmax.f32 %v616_v48, 0.0 }
 0x23e   :  { %v588_v57 = vpop.permute.xlu1 %587 }
 0x23f   :  { %v593_v3 = vpop.permute.xlu0 %592  ;;  %v617_v39 = vadd.f32 %v588_v57, %v545_v23 }
 0x240   :  { %v618_v13 = vadd.f32 %v593_v3, %v546_v26 }
 0x241   :  { %v629_v35 = vmax.f32 %v617_v39, 0.0 }
 0x242   :  { %v630_v18 = vmax.f32 %v618_v13, 0.0 }
 0x244   :  { %650 = vmatpush.msra.mxu1 %v630_v18 }
 0x246   :  { %651 = vmatpush.msra.mxu1 %v629_v35 }
 0x247   :  { %v563_v10 = vpop.permute.xlu1 %562  ;;  %v568_v56 = vpop.permute.xlu0 %567 }
 0x248   :  { %v613_v46 = vadd.f32 %v568_v56, %v541_v33  ;;  %652 = vmatpush.msra.mxu1 %v628_v37  ;;  %v612_v6 = vadd.f32 %v563_v10, %v540_v29  ;;  %v860_v10 = vmov 3   ;;  %v861_v56 = vmov 5  }
 0x249   :  { %821 = vset.pattern.permute.xlu1 %v860_v10 }
 0x24a   :  { %653 = vmatpush.msra.mxu1 %v627_v32  ;;  %v625_v41 = vmax.f32 %v613_v46, 0.0  ;;  %v624_v44 = vmax.f32 %v612_v6, 0.0  ;;  %v862_v6 = vmov 4  }
 0x24c   :  { %654 = vmatpush.msra.mxu1 %v626_v22 }
 0x24e   :  { %655 = vmatpush.msra.mxu1 %v625_v41 }
 0x24f   :  { %v558_v31 = vpop.permute.xlu1 %557  ;;  %v553_v52 = vpop.permute.xlu0 %552 }
 0x250   :  { %v611_v5 = vadd.f32 %v558_v31, %v539_v47  ;;  %v610_v53 = vadd.f32 %v553_v52, %v538_v36  ;;  %656 = vmatpush.msra.mxu1 %v624_v44 }
 0x252   :  { %v623_v30 = vmax.f32 %v611_v5, 0.0  ;;  %v622_v43 = vmax.f32 %v610_v53, 0.0 }
 0x254   :  { %657 = vmatpush.msra.mxu1 %v623_v30 }
 0x256   :  { %658 = vmatpush.msra.mxu1 %v622_v43 }
 0x257   :  { %798 = vmatmul.msk.f32.vlgmr.msra.gmra.mxu1 %vm636_vm6, %v634_v25 }
 0x25f   :  { %799 = vmatmul.msk.f32.gmra.mxu1 %vm636_vm6, %v635_v17 }
 0x2d4   :  { %v660_v59 = vpop.f32.mrf.mxu1 }
 0x2d5   :  { %v1291_v62 = vsel %vm668_vm7, %v660_v59, 0.0 }
 0x2d6   :  { %673 = vadd.xlane.f32.xlu2 %v1291_v62  ;;  %v677_v50 = vmul.f32 %v1291_v62, %v1291_v62 }
 0x2d8   :  { %679 = vadd.xlane.f32.xlu0 %v677_v50 }
 0x2dc   :  { %v663_v7 = vpop.f32.mrf.mxu1 }
 0x2dd   :  { %v1296_v14 = vsel %vm668_vm7, %v663_v7, 0.0 }
 0x2de   :  { %675 = vadd.xlane.f32.xlu1 %v1296_v14  ;;  %v678_v28 = vmul.f32 %v1296_v14, %v1296_v14 }
 0x2e0   :  { %681 = vadd.xlane.f32.xlu2 %v678_v28 }
 0x349   :  { %v674_v0 = vpop.xlane.xlu2 %673 }
 0x34a   :  { %v683_v54 = vmul.f32 0.125, %v674_v0 }
 0x34b   :  { %v680_v63 = vpop.xlane.xlu0 %679 }
 0x34c   :  { %v687_v4 = vmul.f32 %v683_v54, %v683_v54  ;;  %v685_v8 = vmul.f32 0.125, %v680_v63 }
 0x34e   :  { %v689_v9 = vsub.f32 %v685_v8, %v687_v4 }
 0x350   :  { %v691_v58 = vmax.f32 %v689_v9, 0.0 }
 0x351   :  { %v676_v15 = vpop.xlane.xlu1 %675 }
 0x352   :  { %v693_v60 = vadd.f32 1e-05, %v691_v58  ;;  %v684_v1 = vmul.f32 0.125, %v676_v15 }
 0x353   :  { %v682_v12 = vpop.xlane.xlu2 %681 }
 0x354   :  { %851 = vrsqrt.f32 %v693_v60  ;;  %v688_v40 = vmul.f32 %v684_v1, %v684_v1  ;;  %v686_v16 = vmul.f32 0.125, %v682_v12  ;;  %vm701_vm9 = vweird.f32 %v693_v60 }
 0x356   :  { %v690_v49 = vsub.f32 %v686_v16, %v688_v40 }
 0x358   :  { %v692_v45 = vmax.f32 %v690_v49, 0.0 }
 0x35a   :  { %v852_v55 = vpop.eup %851  ;;  %v694_v11 = vadd.f32 1e-05, %v692_v45 }
 0x35b   :  { %v696_v23 = vmul.f32 %v852_v55, %v693_v60  ;;  %vm702_vm8 = vweird.f32 %v852_v55 }
 0x35c   :  { %853 = vrsqrt.f32 %v694_v11  ;;  %vm703_vm10 = vmor %vm701_vm9, %vm702_vm8  ;;  %vm711_vm11 = vweird.f32 %v694_v11 }
 0x35d   :  { %v697_v26 = vmul.f32 %v852_v55, %v696_v23 }
 0x35f   :  { %v698_v57 = vmul.f32 0.5, %v697_v26 }
 0x361   :  { %v699_v3 = vsub.f32 1.5, %v698_v57 }
 0x362   :  { %v854_v20 = vpop.eup %853 }
 0x363   :  { %v706_v39 = vmul.f32 %v854_v20, %v694_v11  ;;  %v700_v13 = vmul.f32 %v852_v55, %v699_v3  ;;  %vm712_vm12 = vweird.f32 %v854_v20 }
 0x364   :  { %vm713_vm13 = vmor %vm711_vm11, %vm712_vm12 }
 0x365   :  { %v707_v38 = vmul.f32 %v854_v20, %v706_v39  ;;  %v704_v42 = vsel %vm703_vm10, %v852_v55, %v700_v13 }
 0x366   :  { %v715_v2 = vmul.f32 %v704_v42, %v1210_v34 }
 0x367   :  { %v708_v48 = vmul.f32 0.5, %v707_v38 }
 0x368   :  { %731 = vperm.xlu2 %819, %v715_v2   ;;  %v717_v18 = vmul.f32 %v715_v2, %v683_v54 }
 0x369   :  { %v709_v21 = vsub.f32 1.5, %v708_v48 }
 0x36a   :  { %721 = vrot.lane.b32.xlu1 %v717_v18, %s856_s20 }
 0x36b   :  { %v710_v35 = vmul.f32 %v854_v20, %v709_v21 }
 0x36d   :  { %v714_v33 = vsel %vm713_vm13, %v854_v20, %v710_v35 }
 0x36e   :  { %v716_v24 = vmul.f32 %v714_v33, %v1238_v61 }
 0x370   :  { %v718_v37 = vmul.f32 %v716_v24, %v684_v1  ;;  %822 = vset.pattern.permute.xlu2 %v860_v10 }
 0x372   :  { %723 = vrot.lane.b32.xlu0 %v718_v37, %s856_s20 }
 0x37a   :  { %736 = vperm.xlu0 %820, %v716_v24  }
 0x382   :  { %825 = vset.pattern.permute.xlu0 %v861_v56 }
 0x383   :  { %775 = vperm.xlu0 %825, %v1210_v34  }
 0x3c2   :  { %v732_v19 = vpop.permute.xlu2 %731 }
 0x3c3   :  { %v739_v44 = vmul.f32 %v732_v19, %v1291_v62 }
 0x3dc   :  { %v722_v29 = vpop.permute.xlu1 %721 }
 0x3dd   :  { %v727_v32 = vsub.f32 %v1210_v34, %v722_v29 }
 0x3df   :  { %743 = vperm.xlu1 %821, %v727_v32  }
 0x3e4   :  { %v724_v46 = vpop.permute.xlu0 %723 }
 0x3e5   :  { %v728_v22 = vsub.f32 %v1238_v61, %v724_v46 }
 0x3e7   :  { %823 = vset.pattern.permute.xlu1 %v862_v6  ;;  %748 = vperm.xlu2 %822, %v728_v22  }
 0x3e8   :  { %757 = vperm.xlu1 %823, %v1210_v34  }
 0x3ec   :  { %v737_v47 = vpop.permute.xlu0 %736 }
 0x3ed   :  { %v740_v31 = vmul.f32 %v737_v47, %v1296_v14 }
 0x3ef   :  { %824 = vset.pattern.permute.xlu2 %v862_v6 }
 0x3f0   :  { %762 = vperm.xlu2 %824, %v1238_v61  }
 0x3f5   :  { %v776_v0 = vpop.permute.xlu0 %775 }
 0x441   :  { %v749_v41 = vpop.permute.xlu2 %748 }
 0x442   :  { %v752_v52 = vadd.f32 %v749_v41, %v740_v31 }
 0x444   :  { %v754_v30 = vmax.f32 %v752_v52, 0.0 }
 0x44a   :  { %v763_v53 = vpop.permute.xlu2 %762 }
 0x44b   :  { %v766_v17 = vmul.f32 %v763_v53, %v754_v30 }
 0x451   :  { %v744_v36 = vpop.permute.xlu1 %743 }
 0x452   :  { %v751_v5 = vadd.f32 %v744_v36, %v739_v44 }
 0x454   :  { %v753_v43 = vmax.f32 %v751_v5, 0.0 }
 0x45a   :  { %v758_v25 = vpop.permute.xlu1 %757 }
 0x45b   :  { %v765_v27 = vmul.f32 %v758_v25, %v753_v43 }
 0x45d   :  { %v767_v34 = vadd.f32 %v766_v17, %v765_v27 }
 0x45f   :  { %v768_v59 = vrot.slane %v767_v34, 4 }
 0x461   :  { %v769_v50 = vadd.f32 %v768_v59, %v767_v34 }
 0x463   :  { %v770_v61 = vrot.slane %v769_v50, 2 }
 0x465   :  { %v771_v7 = vadd.f32 %v770_v61, %v769_v50 }
 0x467   :  { %v772_v28 = vrot.slane %v771_v7, 1 }
 0x469   :  { %v773_v51 = vadd.f32 %v772_v28, %v771_v7 }
 0x46b   :  { %v778_v54 = vadd.f32 %v776_v0, %v773_v51 }
 0x46d   :  { %779 = vst [vmem:[%s1320_s5] sm:$0x1] %v778_v54 }

</bundles_post_ra>
